<compile_context>
chip_gen: v7x
topology: tpu7x:2x2x1
jax: 0.10.0
libtpu: 0.0.40
codegen_flags: <defaults>
</compile_context>

<pallas_src>
import functools
import math

import jax
import jax.numpy as jnp
from jax import lax
from jax.experimental import pallas as pl
from jax.experimental.pallas import tpu as pltpu


def _round_up(a, b):
    return (a + b - 1) // b * b


def _vmem_capacity_bytes():
    try:
        cap = getattr(pltpu.get_tpu_info(), "vmem_capacity_bytes", None)
        if cap:
            return int(cap)
    except Exception:
        pass
    return 64 * 1024 * 1024          # conservative fallback: v7x per-TC VMEM


def _pick_tiles(n_batch, m_rows, k_dim, c_out, compute_itemsize, out_itemsize,
                budget_bytes):
    """Pick (TM, TK): lane-dense M tile and a K tile (TK | K) fitting the VMEM budget."""
    # TM: multiple of 128 on the lane axis; capped at 2048 and so that the
    # parallel (n, m) grid has >= ~8 tiles.
    tm_cap = min(2048, _round_up(max(m_rows, 1), 128))
    want_tiles = 8
    if n_batch < want_tiles:
        per_batch = -(-want_tiles // n_batch)
        tm_cap = min(tm_cap, max(128, (m_rows // per_batch) // 128 * 128))
    tm_cap = max(tm_cap, 128)

    # TK candidates: whole K first (single accumulation pass), then divisors of K
    # that are multiples of 128 (aligned blocks for both the weights and x).
    tk_cands = [k_dim]
    t = (k_dim // 128) * 128
    while t >= 128:
        if t != k_dim and k_dim % t == 0:
            tk_cands.append(t)
        t -= 128

    def fits(tm, tk):
        x_b = 2 * tk * tm * compute_itemsize      # double-buffered activation tile
        w_b = 2 * c_out * tk * compute_itemsize   # double-buffered weight tile
        o_b = 2 * c_out * tm * out_itemsize       # double-buffered output tile
        a_b = c_out * tm * 4                      # f32 accumulator scratch
        bias_b = 2 * c_out * 128 * 4              # (Cout, 1) bias, lane padded
        return x_b + w_b + o_b + a_b + bias_b <= budget_bytes

    tm = tm_cap
    while tm >= 128:
        for tk in tk_cands:
            if fits(tm, tk):
                return tm, tk
        tm -= 128
    return 128, tk_cands[-1]


def _down_conv_kernel(x_ref, w_ref, b_ref, o_ref, acc_ref, *, negative_slope):
    """One grid step = one (Cout, TM) output tile, accumulating over the K axis.

    x_ref : (TK, TM)    space-to-depth patch columns (VMEM, double buffered)
    w_ref : (Cout, TK)  folded weights               (VMEM, double buffered)
    b_ref : (Cout, 1)   bias (f32)                   (VMEM)
    o_ref : (Cout, TM)  output tile (lane-dense)     (VMEM)
    acc   : (Cout, TM)  f32 accumulator scratch
    """
    k = pl.program_id(2)

    @pl.when(k == 0)
    def _init():
        acc_ref[...] = jnp.zeros_like(acc_ref)

    acc_ref[...] += jnp.dot(w_ref[...], x_ref[...],
                            preferred_element_type=jnp.float32)

    @pl.when(k == pl.num_programs(2) - 1)
    def _finalize():
        y = acc_ref[...] + b_ref[...].astype(jnp.float32)
        # LeakyReLU (PyTorch default negative_slope = 0.01), fused on the VPU.
        y = jnp.where(y >= 0, y, negative_slope * y)
        o_ref[...] = y.astype(o_ref.dtype)


def downsampling_conv_block_forward(x, w, b, *, stride=2, negative_slope=0.01,
                                    compute_dtype=jnp.bfloat16):
    """DownsamplingConvBlock.forward.

    x: (N, Cin, D, H, W) NCDHW (PyTorch layout)
    w: (Cout, Cin, s, s, s) (PyTorch Conv3d layout), b: (Cout,)
    Returns NCDHW output of shape (N, Cout, D//s, H//s, W//s).
    """
    s = int(stride)
    N, Cin, D, H, W = x.shape
    Cout = w.shape[0]
    assert w.shape == (Cout, Cin, s, s, s)
    Do, Ho, Wo = D // s, H // s, W // s
    out_dtype = x.dtype

    K = Cin * s * s * s
    Mrows = Do * Ho * Wo

    c_isz = jnp.dtype(compute_dtype).itemsize
    o_isz = jnp.dtype(out_dtype).itemsize

    # Generation-aware VMEM budget (v7x: 64 MiB/TC, v5e/v6e: 128 MiB).
    vmem_cap = _vmem_capacity_bytes()
    vmem_limit = min(vmem_cap * 3 // 4, 100 * 1024 * 1024)
    budget = int(vmem_limit * 0.7)

    TM, TK = _pick_tiles(N, Mrows, K, Cout, c_isz, o_isz, budget)
    Mp = _round_up(Mrows, TM)
    nk = K // TK        # TK divides K by construction

    # PyTorch Conv3d with padding=0 floors the output size -> crop any remainder,
    # then space-to-depth to (N, K, M) with K ordered (ci, kd, kh, kw) so it matches
    # w.reshape(Cout, K).  The long M axis lands on lanes -> lane-dense output stores.
    # allow_input_fusion below lets XLA fuse this reshape/transpose/pad into the
    # Pallas input DMA instead of materializing it in HBM.
    xt = x[:, :, :Do * s, :Ho * s, :Wo * s]
    xt = xt.reshape(N, Cin, Do, s, Ho, s, Wo, s)
    xt = jnp.transpose(xt, (0, 1, 3, 5, 7, 2, 4, 6))   # (N, Cin, s, s, s, Do, Ho, Wo)
    xt = xt.reshape(N, K, Mrows).astype(compute_dtype)
    if Mp != Mrows:
        xt = jnp.pad(xt, ((0, 0), (0, 0), (0, Mp - Mrows)))

    wt = w.reshape(Cout, K).astype(compute_dtype)
    bt = b.reshape(Cout, 1).astype(jnp.float32)

    kernel = functools.partial(_down_conv_kernel, negative_slope=negative_slope)

    out = pl.pallas_call(
        kernel,
        out_shape=jax.ShapeDtypeStruct((N, Cout, Mp), out_dtype),
        grid_spec=pltpu.PrefetchScalarGridSpec(
            num_scalar_prefetch=0,
            grid=(N, Mp // TM, nk),
            in_specs=[
                pl.BlockSpec((None, TK, TM), lambda n, m, k: (n, k, m)),
                pl.BlockSpec((Cout, TK), lambda n, m, k: (0, k)),
                pl.BlockSpec((Cout, 1), lambda n, m, k: (0, 0)),
            ],
            out_specs=pl.BlockSpec((None, Cout, TM), lambda n, m, k: (n, 0, m)),
            scratch_shapes=[pltpu.VMEM((Cout, TM), jnp.float32)],
        ),
        compiler_params=pltpu.CompilerParams(
            dimension_semantics=("parallel", "parallel", "arbitrary"),
            vmem_limit_bytes=int(vmem_limit),
            allow_input_fusion=[True, False, False],
        ),
        cost_estimate=pl.CostEstimate(
            flops=2 * N * Mp * K * Cout,
            transcendentals=0,
            bytes_accessed=(N * Mp * K + Cout * K) * c_isz
                           + N * Mp * Cout * o_isz + Cout * 4,
        ),
    )(xt, wt, bt)

    # (N, Cout, M) reshapes straight to NCDHW -> no output transpose pass.
    out = out[:, :, :Mrows].reshape(N, Cout, Do, Ho, Wo)
    return out


def init_downsampling_params(key, n_filters_in, n_filters_out, stride=2):
    """Deterministic Conv3d-style init (uniform +-1/sqrt(fan_in)); PyTorch (O,I,kd,kh,kw)."""
    s = int(stride)
    kw_key, kb_key = jax.random.split(key)
    fan_in = n_filters_in * s ** 3
    bound = 1.0 / math.sqrt(fan_in)
    w = jax.random.uniform(kw_key, (n_filters_out, n_filters_in, s, s, s),
                           jnp.float32, -bound, bound)
    b = jax.random.uniform(kb_key, (n_filters_out,), jnp.float32, -bound, bound)
    return w, b


def _reference_forward(x, w, b, *, stride=2, negative_slope=0.01, compute_dtype=None):
    """Pure-JAX reference (strided VALID conv) for correctness checking."""
    s = int(stride)
    xc = x.astype(compute_dtype) if compute_dtype is not None else x
    wc = w.astype(compute_dtype) if compute_dtype is not None else w
    y = lax.conv_general_dilated(
        xc, wc, window_strides=(s, s, s), padding="VALID",
        dimension_numbers=("NCDHW", "OIDHW", "NCDHW"),
        preferred_element_type=jnp.float32,
        precision=lax.Precision.HIGHEST)
    y = y + b.astype(jnp.float32).reshape(1, -1, 1, 1, 1)
    y = jnp.where(y >= 0, y, negative_slope * y)
    return y.astype(x.dtype)


if __name__ == "__main__":
    key = jax.random.PRNGKey(0)

    # --- Test 1: default bf16-streaming path (even spatial dims, multi-batch) ---
    N, Cin, Cout, S, stride = 2, 8, 16, 16, 2
    key, kx, kp = jax.random.split(key, 3)
    x = jax.random.normal(kx, (N, Cin, S, S, S), jnp.float32)      # NCDHW
    w, b = init_downsampling_params(kp, Cin, Cout, stride)

    fwd = jax.jit(functools.partial(downsampling_conv_block_forward, stride=stride))
    out = jax.block_until_ready(fwd(x, w, b))
    assert out.shape == (N, Cout, S // stride, S // stride, S // stride), out.shape

    ref = _reference_forward(x, w, b, stride=stride, compute_dtype=jnp.bfloat16)
    err1 = float(jnp.max(jnp.abs(out - ref)))
    assert jnp.allclose(out, ref, atol=5e-3, rtol=5e-3), f"bf16 path mismatch: {err1}"

    # --- Test 2: f32 path, odd spatial dims (exercises crop + M padding) ---
    N2, Cin2, Cout2, S2 = 1, 4, 16, 9
    key, kx2, kp2 = jax.random.split(key, 3)
    x2 = jax.random.normal(kx2, (N2, Cin2, S2, S2, S2), jnp.float32)
    w2, b2 = init_downsampling_params(kp2, Cin2, Cout2, stride)

    fwd32 = jax.jit(functools.partial(downsampling_conv_block_forward,
                                      stride=stride, compute_dtype=jnp.float32))
    out2 = jax.block_until_ready(fwd32(x2, w2, b2))
    assert out2.shape == (N2, Cout2, S2 // stride, S2 // stride, S2 // stride), out2.shape

    ref2 = _reference_forward(x2, w2, b2, stride=stride)
    err2 = float(jnp.max(jnp.abs(out2 - ref2)))
    assert jnp.allclose(out2, ref2, atol=1e-3, rtol=1e-3), f"f32 path mismatch: {err2}"

    print("KERNEL_OK")
</pallas_src>

<mosaic_0001>
module attributes {stable_mosaic.version = 11 : i64} {
  func.func @_down_conv_kernel(%arg0: i32, %arg1: i32, %arg2: i32, %arg3: memref<1x64x128xbf16, #tpu.memory_space<vmem>>, %arg4: memref<16x64xbf16, #tpu.memory_space<vmem>>, %arg5: memref<16x1xf32, #tpu.memory_space<vmem>>, %arg6: memref<1x16x128xf32, #tpu.memory_space<vmem>>, %arg7: memref<16x128xf32, #tpu.memory_space<vmem>>) attributes {dimension_semantics = [#tpu.dimension_semantics<parallel>, #tpu.dimension_semantics<parallel>, #tpu.dimension_semantics<arbitrary>], iteration_bounds = array<i64: 2, 4, 1>, scalar_prefetch = 0 : i64, scratch_operands = 1 : i64, tpu.core_type = #tpu.core_type<tc>, window_params = [{transform_indices = @transform_0, window_bounds = array<i64: 1, 64, 128>}, {transform_indices = @transform_1, window_bounds = array<i64: 16, 64>}, {pipeline_mode = #tpu.pipeline_mode<synchronous>, transform_indices = @transform_2, window_bounds = array<i64: 16, 1>}, {transform_indices = @transform_3, window_bounds = array<i64: 1, 16, 128>}]} {
    %c0_i32 = arith.constant 0 : i32
    %0 = arith.cmpi eq, %arg2, %c0_i32 : i32
    %1 = arith.extui %0 : i1 to i32
    %c0_i32_0 = arith.constant 0 : i32
    %2 = arith.cmpi ne, %1, %c0_i32_0 : i32
    scf.if %2 {
      %cst_11 = arith.constant 0.000000e+00 : f32
      %13 = vector.broadcast %cst_11 : f32 to vector<16x128xf32>
      %c0_12 = arith.constant 0 : index
      %c0_13 = arith.constant 0 : index
      %14 = vector.load %arg7[%c0_12, %c0_13] : memref<16x128xf32, #tpu.memory_space<vmem>>, vector<16x128xf32>
      tpu.vector_store %arg7[%c0_12, %c0_13], %13 {strides = array<i32>} : memref<16x128xf32, #tpu.memory_space<vmem>>, vector<16x128xf32>,
    } else {
    }
    %c0 = arith.constant 0 : index
    %c0_1 = arith.constant 0 : index
    %3 = vector.load %arg7[%c0, %c0_1] : memref<16x128xf32, #tpu.memory_space<vmem>>, vector<16x128xf32>
    %c0_2 = arith.constant 0 : index
    %c0_3 = arith.constant 0 : index
    %4 = vector.load %arg4[%c0_2, %c0_3] : memref<16x64xbf16, #tpu.memory_space<vmem>>, vector<16x64xbf16>
    %c0_4 = arith.constant 0 : index
    %c0_5 = arith.constant 0 : index
    %c0_6 = arith.constant 0 : index
    %5 = vector.load %arg3[%c0_4, %c0_5, %c0_6] : memref<1x64x128xbf16, #tpu.memory_space<vmem>>, vector<1x64x128xbf16>
    %6 = vector.shape_cast %5 : vector<1x64x128xbf16> to vector<64x128xbf16>
    %cst = arith.constant dense<0.000000e+00> : vector<16x128xf32>
    %7 = tpu.matmul %4, %6, %cst {dimension_numbers = #tpu.dot_dimension_numbers<[1], [0], [0], [1], [0, 0, 1, 1], [], []>} : vector<16x64xbf16>, vector<64x128xbf16>, vector<16x128xf32> -> vector<16x128xf32>
    %8 = arith.addf %3, %7 : vector<16x128xf32>
    %c0_7 = arith.constant 0 : index
    %c0_8 = arith.constant 0 : index
    %9 = vector.load %arg7[%c0_7, %c0_8] : memref<16x128xf32, #tpu.memory_space<vmem>>, vector<16x128xf32>
    tpu.vector_store %arg7[%c0_7, %c0_8], %8 {strides = array<i32>} : memref<16x128xf32, #tpu.memory_space<vmem>>, vector<16x128xf32>,
    %c0_i32_9 = arith.constant 0 : i32
    %10 = arith.cmpi eq, %arg2, %c0_i32_9 : i32
    %11 = arith.extui %10 : i1 to i32
    %c0_i32_10 = arith.constant 0 : i32
    %12 = arith.cmpi ne, %11, %c0_i32_10 : i32
    scf.if %12 {
      %c0_11 = arith.constant 0 : index
      %c0_12 = arith.constant 0 : index
      %13 = vector.load %arg7[%c0_11, %c0_12] : memref<16x128xf32, #tpu.memory_space<vmem>>, vector<16x128xf32>
      %c0_13 = arith.constant 0 : index
      %c0_14 = arith.constant 0 : index
      %14 = vector.load %arg5[%c0_13, %c0_14] : memref<16x1xf32, #tpu.memory_space<vmem>>, vector<16x1xf32>
      %15 = vector.broadcast %14 : vector<16x1xf32> to vector<16x128xf32>
      %16 = arith.addf %13, %15 : vector<16x128xf32>
      %cst_15 = arith.constant 0.000000e+00 : f32
      %17 = vector.broadcast %cst_15 : f32 to vector<16x128xf32>
      %18 = arith.cmpf oge, %16, %17 : vector<16x128xf32>
      %cst_16 = arith.constant 0.00999999977 : f32
      %19 = vector.broadcast %cst_16 : f32 to vector<16x128xf32>
      %20 = arith.mulf %19, %16 : vector<16x128xf32>
      %21 = arith.select %18, %16, %20 : vector<16x128xi1>, vector<16x128xf32>
      %c0_17 = arith.constant 0 : index
      %c0_18 = arith.constant 0 : index
      %c0_19 = arith.constant 0 : index
      %22 = vector.load %arg6[%c0_17, %c0_18, %c0_19] : memref<1x16x128xf32, #tpu.memory_space<vmem>>, vector<1x16x128xf32>
      %23 = vector.shape_cast %22 : vector<1x16x128xf32> to vector<16x128xf32>
      %24 = vector.shape_cast %21 : vector<16x128xf32> to vector<1x16x128xf32>
      tpu.vector_store %arg6[%c0_17, %c0_18, %c0_19], %24 {strides = array<i32>} : memref<1x16x128xf32, #tpu.memory_space<vmem>>, vector<1x16x128xf32>,
    } else {
    }
    return
  }
  func.func @transform_0(%arg0: i32, %arg1: i32, %arg2: i32) -> (i32, i32, i32) {
    %c0_i32 = arith.constant 0 : i32
    return %arg0, %arg2, %arg1 : i32, i32, i32
  }
  func.func @transform_1(%arg0: i32, %arg1: i32, %arg2: i32) -> (i32, i32) {
    %c0_i32 = arith.constant 0 : i32
    %c0_i32_0 = arith.constant 0 : i32
    return %c0_i32, %arg2 : i32, i32
  }
  func.func @transform_2(%arg0: i32, %arg1: i32, %arg2: i32) -> (i32, i32) {
    %c0_i32 = arith.constant 0 : i32
    %c0_i32_0 = arith.constant 0 : i32
    %c0_i32_1 = arith.constant 0 : i32
    return %c0_i32, %c0_i32_0 : i32, i32
  }
  func.func @transform_3(%arg0: i32, %arg1: i32, %arg2: i32) -> (i32, i32, i32) {
    %c0_i32 = arith.constant 0 : i32
    %c0_i32_0 = arith.constant 0 : i32
    return %arg0, %c0_i32, %arg1 : i32, i32, i32
  }
}

</mosaic_0001>

<bundles_post_ra>
// kernel: downsampling_conv_block_forward.1
= control target key start
LH: loop header
LB: loop body
LE: loop exit
PB: predicated region body
PF: predicated region fallthrough
CT: control target
= control target key end

     0   :  { %s728_s12 = smov 0   ;;  %s730_s13 = smov 0   ;;  %s833_s0 = inlined_call_operand.vmem [shape: bf16[2,64,512], index: 0, kind: input, shape index: {}]   ;;  %s834_s1 = inlined_call_operand.vmem [shape: bf16[16,64], index: 1, kind: input, shape index: {}]   ;;  %s835_s2 = inlined_call_operand.vmem [shape: f32[16,1], index: 2, kind: input, shape index: {}]   ;;  %s836_s3 = inlined_call_operand.vmem [shape: f32[2,16,512], index: 3, kind: output, shape index: {}]  }
   0x1   :  { %s732_s14 = smov 0   ;;  %s734_s15 = smov 0  }
   0x2   :  { %s736_s16 = smov 0   ;;  %s738_s17 = smov 0  }
   0x3   :  { %s740_s18 = smov 0  }
   0x4 LB: > { %s28_s19 = sadd.s32 1, %s695_s16  ;;  %s32_s20 = sadd.s32 1, %s699_s17  ;;  %s703_s18 = sphi %s740_s18, %s13_s18   ;;  %s699_s17 = sphi %s738_s17, %s843_s17   ;;  %s695_s16 = sphi %s736_s16, %s842_s16   ;;  %s691_s15 = sphi %s734_s15, %s841_s15   ;;  %s687_s14 = sphi %s732_s14, %s840_s14   ;;  %s683_s13 = sphi %s730_s13, %s839_s13   ;;  %s679_s12 = sphi %s728_s12, %s838_s12  }
   0x5   : > { %p30_p0 = scmp.ge.s32.totalorder %s28_s19, 4  ;;  %s545_s21 = sadd.s32 4294967295, %s703_s18  }
   0x6   : > { %p50_p1 = scmp.ne.s32.totalorder %s683_s13, %s679_s12  ;;  %p51_p2 = scmp.eq.s32.totalorder %s703_s18, 0 }
   0x7   : > { %s845_s19 = smov (%p30_p0, %s28_s19), 0  ;;  %s847_s20 = smov (!%p30_p0, %s32_s20), %s699_s17 }
   0x8   : > { %p34_p3 = scmp.ge.s32.totalorder %s847_s20, 2  ;;  %p129_p4 = scmp.eq.s32.totalorder %s545_s21, 7 }
   0x9   : > { %s39_s22 = ssub.s32 %s695_s16, %s845_s19  ;;  %p52_p5 = por %p51_p2, %p50_p1 }
   0xa   : > { %s849_s20 = smov (%p34_p3, %s847_s20), 0  ;;  %p776_p6 = por %p129_p4, %p50_p1 }
   0xb   : > { %s36_s24 = ssub.s32 %s699_s17, %s849_s20  ;;  %s43_s26 = sadd.s32 1, %s683_s13 }
   0xc   : > { %s40_s25 = sor.u32 %s39_s22, %s36_s24  ;;  %p549_p8 = scmp.ge.s32.totalorder %s703_s18, 8 }
   0xd   : > { %p41_p7 = scmp.eq.s32.totalorder %s40_s25, 0 }
   0xe   : > { %161 = sbr.rel (%p549_p8) target bundleno = 32 (0x20), region = 24 }
   0xf   : > { %s784_s27 = scalar_select %p41_p7, %s683_s13, %s43_s26  }
  0x15   : > { %164 = sbr.rel (!%p52_p5) target bundleno = 32 (0x20), region = 28  ;;  %s166_s28 = sand.u32 (%p52_p5), 1, %s683_s13  }
  0x16   : > { %s551_s29 = sshll.u32 (%p52_p5), %s699_s17, 5  ;;  %s550_s30 = sshll.u32 (%p52_p5), %s166_s28, 5 }
  0x17   : > { %s173_s4 = sadd.s32 (%p52_p5), %s695_s16, %s551_s29  ;;  %s168_s9 = scalar_lea.vmem (%p52_p5), [#allocation3], %s550_s30 }
  0x18   : > { %s552_s5 = sshll.u32 (%p52_p5), %s173_s4, 2 }
  0x19   : > { %s175_s8 = scalar_lea.vmem (%p52_p5), %s833_s0, %s552_s5 }
  0x1a   : > { %v191_v0 = vld [vmem:[%s175_s8] sm:$0xf] (%p52_p5)  ;;  %v193_v1 = vld [vmem:[%s175_s8 + $0x10] sm:$0xf] (%p52_p5) }
  0x1b   : > { %v195_v2 = vld [vmem:[%s175_s8 + $0x20] sm:$0xf] (%p52_p5)  ;;  %192 = vst [vmem:[%s168_s9] sm:$0xf] (%p52_p5), %v191_v0  ;;  %194 = vst [vmem:[%s168_s9 + $0x4] sm:$0xf] (%p52_p5), %v193_v1 }
  0x1c   : > { %196 = vst [vmem:[%s168_s9 + $0x8] sm:$0xf] %v195_v2  ;;  %v197_v3 = vld [vmem:[%s175_s8 + $0x30] sm:$0xf]  ;;  %v199_v4 = vld [vmem:[%s175_s8 + $0x40] sm:$0xf] }
  0x1d   : > { %v201_v5 = vld [vmem:[%s175_s8 + $0x50] sm:$0xf]  ;;  %198 = vst [vmem:[%s168_s9 + $0xc] sm:$0xf] %v197_v3  ;;  %200 = vst [vmem:[%s168_s9 + $0x10] sm:$0xf] %v199_v4 }
  0x1e   : > { %202 = vst [vmem:[%s168_s9 + $0x14] sm:$0xf] %v201_v5  ;;  %v203_v6 = vld [vmem:[%s175_s8 + $0x60] sm:$0xf]  ;;  %v205_v7 = vld [vmem:[%s175_s8 + $0x70] sm:$0xf] }
  0x1f   : > { %204 = vst [vmem:[%s168_s9 + $0x18] sm:$0xf] %v203_v6  ;;  %206 = vst [vmem:[%s168_s9 + $0x1c] sm:$0xf] %v205_v7 }
  0x20 PF: > { %p553_p9 = scmp.ge.s32.totalorder %s703_s18, 1  ;;  %p244_p10 = scmp.lt.s32.totalorder %s703_s18, 9 }
  0x22   : > { %p245_p11 = pnand %p553_p9, %p244_p10 }
  0x23   : > { %s251_s10 = sand.u32 (!%p245_p11), 1, %s679_s12   ;;  %v705_v8 = vmov (!%p245_p11), 0.0   ;;  %vm706_vm0 = vmmov (!%p245_p11), 0   ;;  %v384_v9 = vld [vmem:[%s835_s2] sm:$0xff] (!%p245_p11)  ;;  %v707_v10 = vmov (!%p245_p11), 0   ;;  %v385_v12 = vld [vmem:[%s835_s2 + $0x8] sm:$0xff] (!%p245_p11) }
  0x24   : > { %248 = sbr.rel (%p245_p11) target bundleno = 282 (0x11a), region = 69  ;;  %572 = vmatprep.subr.bf16.mxu0 (!%p245_p11), %v705_v8  ;;  %s554_s11 = sshll.u32 (!%p245_p11), %s251_s10, 5  ;;  %580 = vmatprep.mubr.msk.bf16.mxu0 (!%p245_p11), %vm706_vm0, %v705_v8  ;;  %v648_v16 = vld [vmem:[%s834_s1] sm:$0xff] (!%p245_p11)   ;;  %vm330_vm1 = vcmask (!%p245_p11), 523264  }
  0x25   : > { %643 = vset.pattern.permute.xlu0 (!%p245_p11), %v707_v10  ;;  %s253_s24 = scalar_lea.vmem (!%p245_p11), [#allocation3], %s554_s11  ;;  %s555_s29 = sshll.u32 (!%p245_p11), %s251_s10, 4 }
  0x26   : > { %v644_v11 = vld [vmem:[%s253_s24] sm:$0xff] (!%p245_p11)   ;;  %388 = vperm.xlu0 (!%p245_p11), %643, %v384_v9   ;;  %v645_v13 = vld [vmem:[%s253_s24 + $0x8] sm:$0xff] (!%p245_p11)   ;;  %v646_v14 = vld [vmem:[%s253_s24 + $0x10] sm:$0xff] (!%p245_p11)   ;;  %s276_s30 = scalar_lea.vmem (!%p245_p11), [#allocation4], %s555_s29 }
  0x27   : > { %573 = vmatpush3.bf16.msra.mxu0 (!%p245_p11), %v644_v11  ;;  %v647_v15 = vld [vmem:[%s253_s24 + $0x18] sm:$0xff] (!%p245_p11)  }
  0x28   : > { %574 = vmatprep.subr.bf16.mxu0 (!%p245_p11), %v705_v8 }
  0x2a   : > { %393 = vperm.xlu0 (!%p245_p11), %643, %v385_v12  }
  0x2b   : > { %575 = vmatpush3.bf16.msra.mxu0 %v645_v13  ;;  %s563_s4 = sshll.u32 (%p776_p6), %s691_s15, 3 }
  0x2c   : > { %576 = vmatprep.subr.bf16.mxu0 %v705_v8  ;;  %s414_s5 = sadd.s32 (%p776_p6), %s687_s14, %s563_s4 }
  0x2d   : > { %s564_s6 = sshll.u32 (%p776_p6), %s414_s5, 3 }
  0x2e   : > { %s416_s9 = scalar_lea.vmem (%p776_p6), %s836_s3, %s564_s6 }
  0x2f   : > { %577 = vmatpush3.bf16.msra.mxu0 %v646_v14 }
  0x30   : > { %578 = vmatprep.subr.bf16.mxu0 %v705_v8 }
  0x33   : > { %579 = vmatpush3.bf16.msra.mxu0 %v647_v15 }
  0x36   : > { %581 = vmatmul.mubr.msk.bf16.vlgmr.msra.gmra.mrb[0].mxu0 %vm330_vm1, %v648_v16 }
  0xa5   : > { %v389_v17 = vpop.permute.xlu0 %388 }
  0xa9   : > { %v394_v21 = vpop.permute.xlu0 %393 }
 0x109   : > { %v368_v18 = vpop.f32.mrb[0].mxu0 }
 0x10a   : > { %v396_v19 = vadd.f32 %v389_v17, %v368_v18  ;;  %v582_v20 = vpop.f32.mrb[1].mxu0 }
 0x10b   : > { %v371_v22 = vpop.f32.mrb[2].mxu0  ;;  %412 = sbr.rel (!%p776_p6) target bundleno = 282 (0x11a), region = 85 }
 0x10c   : > { %vm398_vm2 = vcmp.ge.f32.partialorder %v396_v19, 0.0  ;;  %v400_v23 = vmul.f32 0.01, %v396_v19  ;;  %v397_v24 = vadd.f32 %v394_v21, %v371_v22  ;;  %v583_v25 = vpop.f32.mrb[3].mxu0 }
 0x10e   : > { %v402_v26 = vsel %vm398_vm2, %v396_v19, %v400_v23  ;;  %vm399_vm3 = vcmp.ge.f32.partialorder %v397_v24, 0.0  ;;  %v401_v27 = vmul.f32 0.01, %v397_v24 }
 0x10f   : > { %404 = vst [vmem:[%s276_s30] sm:$0xff] %v402_v26 }
 0x110   : > { %v403_v28 = vsel %vm399_vm3, %v397_v24, %v401_v27 }
 0x111   : > { %405 = vst [vmem:[%s276_s30 + $0x8] sm:$0xff] %v403_v28 }
 0x116   : > { %v446_v29 = vld [vmem:[%s276_s30] sm:$0xff] }
 0x117   : > { %447 = vst [vmem:[%s416_s9] sm:$0xff] %v446_v29 }
 0x118   : > { %v448_v30 = vld [vmem:[%s276_s30 + $0x8] sm:$0xff] }
 0x119   : > { %449 = vst [vmem:[%s416_s9 + $0x20] sm:$0xff] %v448_v30 }
 0x11a PF: > { %s13_s18 = sadd.s32 1, %s703_s18   ;;  %s838_s12 = smov %s683_s13 }
 0x11b   : > { %p10_p12 = scmp.ge.s32.totalorder %s13_s18, 10   ;;  %s839_s13 = smov %s784_s27 }
 0x11c   : > { %s840_s14 = smov %s695_s16  ;;  %s841_s15 = smov %s699_s17 }
 0x11d   : > { %s842_s16 = smov %s845_s19  ;;  %s843_s17 = smov %s849_s20 }
 0x11e   :  { %12 = sbr.rel (!%p10_p12) target bundleno = 4 (0x4), region = 157 }

</bundles_post_ra>
